<compile_context>
chip_gen: v5e
topology: v5e:2x2
jax: 0.10.0
libtpu: 0.0.40
codegen_flags: <defaults>
</compile_context>

<pallas_src>
import functools

import jax
import jax.numpy as jnp
from jax.experimental import pallas as pl
from jax.experimental.pallas import tpu as pltpu


def summation_obj_kernel(x_ref, w_ref, b_ref, o_ref, *, seq_len):
    # x_ref: (BB*S, F)   w_ref: (F, TE)   b_ref: (1, TE)   o_ref: (BB, TE)
    # Single 2-D MXU matmul over the collapsed (batch*seq) rows.
    h = jnp.dot(x_ref[...], w_ref[...], preferred_element_type=jnp.float32)
    h = jnp.maximum(h + b_ref[...], 0.0)                  # bias + ReLU (VPU)

    # Sum over the sequence dim (sublane reduce), then ReLU.
    bb = o_ref.shape[0]
    te = h.shape[-1]
    s = jnp.sum(h.reshape(bb, seq_len, te), axis=1)       # (BB, TE)

    # TODO(synk): nn.Dropout(0.5) is identity in eval mode; training-mode
    # stochastic dropout (pltpu.prng_*) is intentionally not applied here.
    o_ref[...] = jnp.maximum(s, 0.0).astype(o_ref.dtype)


def _pick_e_tile(F, Ep, budget_bytes=4 << 20):
    """Largest 128-multiple divisor of Ep whose f32 weight tile fits budget."""
    te = Ep
    while F * te * 4 > budget_bytes and te % 256 == 0:
        te //= 2
    if F * te * 4 > budget_bytes:
        te = 128  # Ep is always a multiple of 128 by construction
    return te


def _pick_batch_block(B, S, F, te, budget_bytes=8 << 20):
    """Largest divisor of B whose per-step f32 footprint (incl. double
    buffering and the h intermediate) fits the budget and whose blocks obey
    the (8, 128) tiling rules."""
    def legal(bb):
        rows_ok = (bb * S) % 8 == 0 or bb == B     # x row-block sublanes
        out_ok = bb % 8 == 0 or bb == B            # output row-block sublanes
        return rows_ok and out_ok

    def fits(bb):
        elems = (2 * bb * S * F      # x block (double-buffered)
                 + 2 * F * te        # weight tile (double-buffered)
                 + 2 * te            # bias tile
                 + 2 * bb * te       # output tile (double-buffered)
                 + bb * S * te)      # f32 h intermediate
        return elems * 4 <= budget_bytes

    divisors = [d for d in range(1, B + 1) if B % d == 0]
    for bb in reversed(divisors):
        if legal(bb) and fits(bb):
            return bb
    for bb in divisors:              # smallest legal block even if over budget
        if legal(bb):
            return bb
    return B


def summation_obj_forward(x, w, b):
    """x: [B, S, F], w: [F, E] (transpose of torch weight), b: [E] -> [B, E]."""
    B, S, F = x.shape
    E = w.shape[1]
    Ep = -(-E // 128) * 128  # pad embedding dim up to a multiple of 128 lanes

    if Ep == E:
        w_p = w
        b_p = b.reshape(1, E)
    else:
        w_p = jnp.zeros((F, Ep), w.dtype).at[:, :E].set(w)
        b_p = jnp.zeros((1, Ep), b.dtype).at[0, :E].set(b)

    x2d = x.reshape(B * S, F)  # collapse batch*seq -> one 2-D MXU matmul

    TE = _pick_e_tile(F, Ep)
    BB = _pick_batch_block(B, S, F, TE)
    grid = (B // BB, Ep // TE)

    cost = pl.CostEstimate(
        flops=2 * B * S * F * Ep,
        transcendentals=0,
        bytes_accessed=4 * (B * S * F + F * Ep + Ep + B * Ep),
    )

    out_p = pl.pallas_call(
        functools.partial(summation_obj_kernel, seq_len=S),
        out_shape=jax.ShapeDtypeStruct((B, Ep), x.dtype),
        grid=grid,
        in_specs=[
            pl.BlockSpec((BB * S, F), lambda i, j: (i, 0)),  # x row-tile
            pl.BlockSpec((F, TE), lambda i, j: (0, j)),      # weight E-tile
            pl.BlockSpec((1, TE), lambda i, j: (0, j)),      # bias E-tile
        ],
        out_specs=pl.BlockSpec((BB, TE), lambda i, j: (i, j)),
        compiler_params=pltpu.CompilerParams(
            dimension_semantics=("parallel", "parallel")),
        cost_estimate=cost,
    )(x2d, w_p, b_p)

    return out_p[:, :E] if Ep != E else out_p


def reference_forward(x, w, b):
    h = jnp.maximum(jnp.einsum("bsf,fe->bse", x, w) + b[None, None, :], 0.0)
    return jnp.maximum(jnp.sum(h, axis=1), 0.0)


if __name__ == "__main__":
    # Small shapes consistent with the module: batch=2, seq=8,
    # feature_length=32, embedding_length=64.
    B, S, F, E = 2, 8, 32, 64

    key = jax.random.PRNGKey(0)
    kx, kw, kb = jax.random.split(key, 3)

    x = jax.random.normal(kx, (B, S, F), dtype=jnp.float32)
    # Deterministic nn.Linear-style init: W, b ~ U(-1/sqrt(F), 1/sqrt(F)).
    bound = 1.0 / (F ** 0.5)
    w = jax.random.uniform(kw, (F, E), minval=-bound, maxval=bound,
                           dtype=jnp.float32)
    b = jax.random.uniform(kb, (E,), minval=-bound, maxval=bound,
                           dtype=jnp.float32)

    out = summation_obj_forward(x, w, b)
    out = jax.block_until_ready(out)

    ref = reference_forward(x, w, b)
    assert out.shape == (B, E)
    assert jnp.allclose(out, ref, atol=1e-4, rtol=1e-4)

    print("KERNEL_OK")
</pallas_src>

<mosaic_0001>
module attributes {stable_mosaic.version = 11 : i64} {
  func.func @summation_obj_kernel(%arg0: i32, %arg1: i32, %arg2: memref<16x32xf32, #tpu.memory_space<vmem>>, %arg3: memref<32x128xf32, #tpu.memory_space<vmem>>, %arg4: memref<1x128xf32, #tpu.memory_space<vmem>>, %arg5: memref<2x128xf32, #tpu.memory_space<vmem>>) attributes {dimension_semantics = [#tpu.dimension_semantics<parallel>, #tpu.dimension_semantics<parallel>], iteration_bounds = array<i64: 1, 1>, scalar_prefetch = 0 : i64, scratch_operands = 0 : i64, tpu.core_type = #tpu.core_type<tc>, window_params = [{transform_indices = @transform_0, window_bounds = array<i64: 16, 32>}, {transform_indices = @transform_1, window_bounds = array<i64: 32, 128>}, {transform_indices = @transform_2, window_bounds = array<i64: 1, 128>}, {transform_indices = @transform_3, window_bounds = array<i64: 2, 128>}]} {
    %c0 = arith.constant 0 : index
    %c0_0 = arith.constant 0 : index
    %0 = vector.load %arg2[%c0, %c0_0] : memref<16x32xf32, #tpu.memory_space<vmem>>, vector<16x32xf32>
    %c0_1 = arith.constant 0 : index
    %c0_2 = arith.constant 0 : index
    %1 = vector.load %arg3[%c0_1, %c0_2] : memref<32x128xf32, #tpu.memory_space<vmem>>, vector<32x128xf32>
    %cst = arith.constant dense<0.000000e+00> : vector<16x128xf32>
    %2 = tpu.matmul %0, %1, %cst {dimension_numbers = #tpu.dot_dimension_numbers<[1], [0], [0], [1], [0, 0, 1, 1], [], []>} : vector<16x32xf32>, vector<32x128xf32>, vector<16x128xf32> -> vector<16x128xf32>
    %c0_3 = arith.constant 0 : index
    %c0_4 = arith.constant 0 : index
    %3 = vector.load %arg4[%c0_3, %c0_4] : memref<1x128xf32, #tpu.memory_space<vmem>>, vector<1x128xf32>
    %4 = vector.broadcast %3 : vector<1x128xf32> to vector<16x128xf32>
    %5 = arith.addf %2, %4 : vector<16x128xf32>
    %cst_5 = arith.constant 0.000000e+00 : f32
    %6 = vector.broadcast %cst_5 : f32 to vector<16x128xf32>
    %7 = arith.maximumf %5, %6 : vector<16x128xf32>
    %8 = vector.shape_cast %7 : vector<16x128xf32> to vector<2x8x128xf32>
    %cst_6 = arith.constant dense<0.000000e+00> : vector<2x128xf32>
    %9 = vector.multi_reduction <add>, %8, %cst_6 [1] : vector<2x8x128xf32> to vector<2x128xf32>
    %cst_7 = arith.constant 0.000000e+00 : f32
    %10 = vector.broadcast %cst_7 : f32 to vector<2x128xf32>
    %11 = arith.maximumf %9, %10 : vector<2x128xf32>
    %c0_8 = arith.constant 0 : index
    %c0_9 = arith.constant 0 : index
    %12 = vector.load %arg5[%c0_8, %c0_9] : memref<2x128xf32, #tpu.memory_space<vmem>>, vector<2x128xf32>
    tpu.vector_store %arg5[%c0_8, %c0_9], %11 {strides = array<i32>} : memref<2x128xf32, #tpu.memory_space<vmem>>, vector<2x128xf32>,
    return
  }
  func.func @transform_0(%arg0: i32, %arg1: i32) -> (i32, i32) {
    %c0_i32 = arith.constant 0 : i32
    %c0_i32_0 = arith.constant 0 : i32
    return %arg0, %c0_i32 : i32, i32
  }
  func.func @transform_1(%arg0: i32, %arg1: i32) -> (i32, i32) {
    %c0_i32 = arith.constant 0 : i32
    %c0_i32_0 = arith.constant 0 : i32
    return %c0_i32, %arg1 : i32, i32
  }
  func.func @transform_2(%arg0: i32, %arg1: i32) -> (i32, i32) {
    %c0_i32 = arith.constant 0 : i32
    %c0_i32_0 = arith.constant 0 : i32
    return %c0_i32, %arg1 : i32, i32
  }
  func.func @transform_3(%arg0: i32, %arg1: i32) -> (i32, i32) {
    %c0_i32 = arith.constant 0 : i32
    return %arg0, %arg1 : i32, i32
  }
}

</mosaic_0001>

<bundles_post_ra>
// kernel: tpu_custom_call.1
= control target key start
LH: loop header
LB: loop body
LE: loop exit
PB: predicated region body
PF: predicated region fallthrough
CT: control target
= control target key end

     0   :  { %8 = vsyncpa [#allocation3], 0  ;;  %s254_s0 = inlined_call_operand.hbm [shape: f32[16,32], index: 0, kind: input, shape index: {}]   ;;  %s255_s1 = inlined_call_operand.hbm [shape: f32[32,128], index: 1, kind: input, shape index: {}]   ;;  %s256_s2 = inlined_call_operand.vmem [shape: f32[1,128], index: 2, kind: input, shape index: {}]   ;;  %s257_s3 = inlined_call_operand.hbm [shape: f32[2,128], index: 3, kind: output, shape index: {}]  }
   0x1   :  { %9 = vsyncpa [#allocation6], 0 }
   0x2   :  { %10 = vsyncpa [#allocation4], 0  ;;  %s15_s14 = sshll.u32 %s254_s0, 4  ;;  %s217_s15 = smov [#allocation2]   ;;  %s16_s14 = int_to_ptr.hbm [resolvable:$true] %s15_s14 }
   0x3   :  { %s17_s16 = sshll.u32 %s217_s15, 4  ;;  %s28_s19 = sshll.u32 %s255_s1, 4  ;;  %s18_s16 = int_to_ptr.vmem [resolvable:$true] %s17_s16  ;;  %s29_s19 = int_to_ptr.hbm [resolvable:$true] %s28_s19 }
   0x4   :  { %s218_s20 = smov 128   ;;  %s219_s21 = smov 8  }
   0x5   :  { %23 = dma.hbm_to_vmem [thread:$0]  %s16_s14, 256, %s18_s16, [#allocation3], %s218_s20, %s218_s20, %s219_s21  }
   0x6   :  { %s220_s22 = smov [#allocation5]  }
   0x7   :  { %s30_s23 = sshll.u32 %s220_s22, 4  ;;  %s31_s23 = int_to_ptr.vmem [resolvable:$true] %s30_s23 }
   0x8   :  { %36 = dma.hbm_to_vmem [thread:$0]  %s29_s19, 512, %s31_s23, [#allocation6], %s218_s20, %s218_s20, %s219_s21  }
   0x9   :  { %211 = dma.done.wait [#allocation3], 256  }
   0xa   :  { %212 = vsyncadd [#allocation3], 4294967040 }
   0xb   :  { %213 = dma.done.wait [#allocation6], 512  }
   0xc   :  { %214 = vsyncadd [#allocation6], 4294966784  ;;  %v52_v0 = vld [vmem:[#allocation5 + $0x18] sm:$0xff]  ;;  %v51_v1 = vld [vmem:[#allocation5 + $0x10] sm:$0xff]  ;;  %vm57_vm0 = vcmask 261120   ;;  %s221_s24 = smov [#allocation7]  }
   0xd   :  { %76 = vmatpush.msra.mxu0 %v52_v0  ;;  %129 = vmatpush.msra.mxu1 %v52_v0  ;;  %v50_v2 = vld [vmem:[#allocation5 + $0x8] sm:$0xff]  ;;  %v49_v3 = vld [vmem:[#allocation5] sm:$0xff]  ;;  %v47_v4 = vld [vmem:[#allocation2] sm:$0xff]  ;;  %s116_s27 = sshll.u32 %s257_s3, 4  ;;  %vm105_vm1 = vcmask 1041409   ;;  %s117_s27 = int_to_ptr.hbm [resolvable:$true] %s116_s27 }
   0xe   :  { %v48_v5 = vld [vmem:[#allocation2 + $0x8] sm:$0xff]  ;;  %v138_v6 = vld [vmem:[%s256_s2] ss:$0 sm:$0xff]  ;;  %s114_s2 = sshll.u32 %s221_s24, 4  ;;  %s115_s2 = int_to_ptr.vmem [resolvable:$true] %s114_s2 }
   0xf   :  { %77 = vmatpush.msra.mxu0 %v51_v1  ;;  %130 = vmatpush.msra.mxu1 %v51_v1 }
  0x11   :  { %78 = vmatpush.msra.mxu0 %v50_v2  ;;  %131 = vmatpush.msra.mxu1 %v50_v2 }
  0x13   :  { %79 = vmatpush.msra.mxu0 %v49_v3  ;;  %132 = vmatpush.msra.mxu1 %v49_v3 }
  0x14   :  { %127 = vmatmul.msk.f32.vlgmr.msra.gmra.mxu0 %vm57_vm0, %v47_v4  ;;  %128 = vmatmul.msk.f32.vlgmr.msra.gmra.mxu1 %vm57_vm0, %v48_v5 }
  0x91   :  { %v81_v7 = vpop.f32.mrf.mxu0  ;;  %v84_v8 = vpop.f32.mrf.mxu1 }
  0x92   :  { %v82_v9 = vadd.f32 %v138_v6, %v81_v7  ;;  %v85_v10 = vadd.f32 %v138_v6, %v84_v8 }
  0x94   :  { %v87_v11 = vmax.f32 %v82_v9, 0.0  ;;  %v88_v12 = vmax.f32 %v85_v10, 0.0 }
  0x96   :  { %v89_v13 = vrot.slane %v87_v11, 4  ;;  %v95_v14 = vrot.slane %v88_v12, 4 }
  0x98   :  { %v90_v15 = vadd.f32 %v89_v13, %v87_v11  ;;  %v96_v16 = vadd.f32 %v95_v14, %v88_v12 }
  0x9a   :  { %v91_v17 = vrot.slane %v90_v15, 2  ;;  %v97_v18 = vrot.slane %v96_v16, 2 }
  0x9c   :  { %v92_v19 = vadd.f32 %v91_v17, %v90_v15  ;;  %v98_v20 = vadd.f32 %v97_v18, %v96_v16 }
  0x9e   :  { %v93_v21 = vrot.slane %v92_v19, 1  ;;  %v99_v22 = vrot.slane %v98_v20, 1 }
  0xa0   :  { %v94_v23 = vadd.f32 %v93_v21, %v92_v19  ;;  %v100_v24 = vadd.f32 %v99_v22, %v98_v20 }
  0xa2   :  { %v101_v25 = vmax.f32 %v94_v23, 0.0  ;;  %v102_v26 = vmax.f32 %v100_v24, 0.0 }
  0xa4   :  { %v106_v27 = vsel %vm105_vm1, %v102_v26, %v101_v25 }
  0xa5   :  { %108 = vst [vmem:[#allocation7] sm:$0x3] %v106_v27 }
  0xa6   :  { %119 = dma.vmem_to_hbm [thread:$0]  %s115_s2, 32, %s117_s27, [#allocation4]  }
  0xa7   :  { %215 = dma.done.wait [#allocation4], 32  }
  0xa8   :  { %216 = vsyncadd [#allocation4], 4294967264 }
  0xa9   :  { %124 = vsyncpa [#allocation3], 1 }
  0xaa   :  { %125 = vsyncpa [#allocation6], 1 }
  0xab   :  { %126 = vsyncpa [#allocation4], 1 }

</bundles_post_ra>
